<compile_context>
chip_gen: v5e
topology: v5e:2x2
jax: 0.10.0
libtpu: 0.0.40
codegen_flags: <defaults>
</compile_context>

<pallas_src>
import functools

import jax
import jax.numpy as jnp
from jax.experimental import pallas as pl
from jax.experimental.pallas import tpu as pltpu


# --------------------------- fused single-pass ------------------------------
def se_fused_kernel(x_ref, w1_ref, b1_ref, w2_ref, b2_ref, out_ref, *, hw_true):
    # x_ref/out_ref: (C, S_pad) one full batch element (spatial zero-padded).
    # w1_ref: (C1, C), b1_ref: (C1, 1), w2_ref: (C, C1), b2_ref: (C, 1)  (f32)
    xf = x_ref[...].astype(jnp.float32)
    # Squeeze: global average pool (lane reduction; zero-pad contributes 0).
    mean = jnp.sum(xf, axis=-1, keepdims=True) * jnp.float32(1.0 / hw_true)
    # Excitation MLP: fc1 -> relu -> fc2 -> sigmoid, all f32.
    h = jnp.dot(w1_ref[...], mean, preferred_element_type=jnp.float32)
    h = jnp.maximum(h + b1_ref[...], 0.0)                                # (C1,1)
    z = jnp.dot(w2_ref[...], h, preferred_element_type=jnp.float32)
    gate = jax.nn.sigmoid(z + b2_ref[...])                               # (C, 1)
    # Excite: broadcast multiply over the spatial (lane) axis.
    out_ref[...] = (xf * gate).astype(out_ref.dtype)


# --------------------- two-pass fallback (large spatial) --------------------
def se_scale_kernel(x_ref, w1_ref, b1_ref, w2_ref, b2_ref, scale_ref, acc_ref,
                    *, hw_true):
    s = pl.program_id(1)

    @pl.when(s == 0)
    def _():
        acc_ref[...] = jnp.zeros_like(acc_ref)

    # Accumulate per-channel spatial sum in f32 across lane-dense tiles.
    acc_ref[...] += jnp.sum(x_ref[...].astype(jnp.float32), axis=-1,
                            keepdims=True)

    @pl.when(s == pl.num_programs(1) - 1)
    def _():
        mean = acc_ref[...] * jnp.float32(1.0 / hw_true)                 # (C,1)
        h = jnp.dot(w1_ref[...], mean, preferred_element_type=jnp.float32)
        h = jnp.maximum(h + b1_ref[...], 0.0)                            # (C1,1)
        z = jnp.dot(w2_ref[...], h, preferred_element_type=jnp.float32)
        scale_ref[...] = jax.nn.sigmoid(z + b2_ref[...]).astype(scale_ref.dtype)


def se_apply_kernel(x_ref, scale_ref, out_ref):
    out_ref[...] = (x_ref[...].astype(jnp.float32) * scale_ref[...]).astype(
        out_ref.dtype)


# --------------------------------- wrapper ----------------------------------
def se_module(x, w1, b1, w2, b2, *, tile_s=512, fused_vmem_budget=24 << 20):
    """SEModule forward.  x: (B, C, H, W) NCHW.  w1: (C1, C), b1: (C1,),
    w2: (C, C1), b2: (C,).  Returns (B, C, H, W)."""
    B, C, H, W = x.shape
    C1 = w1.shape[0]
    HW = H * W
    itemsize = x.dtype.itemsize

    w1f = w1.astype(jnp.float32)
    w2f = w2.astype(jnp.float32)
    b1c = b1.reshape(C1, 1).astype(jnp.float32)
    b2c = b2.reshape(C, 1).astype(jnp.float32)

    hw_pad128 = 128 * pl.cdiv(HW, 128)

    # Rough fused-path VMEM budget: double-buffered in + out slabs + f32 temp.
    fused_bytes = C * hw_pad128 * (4 * itemsize + 4)
    use_fused = fused_bytes <= fused_vmem_budget

    if use_fused:
        s_pad = hw_pad128
        x_flat = x.reshape(B, C, HW)
        if s_pad != HW:
            x_flat = jnp.pad(x_flat, ((0, 0), (0, 0), (0, s_pad - HW)))

        ce = pl.CostEstimate(
            flops=int(B * (2 * C * s_pad + 2 * C1 * C + 2 * C * C1)),
            transcendentals=int(B * C),
            bytes_accessed=int(2 * B * C * s_pad * itemsize
                               + (C1 * C + C * C1 + C1 + C) * 4),
        )
        out_flat = pl.pallas_call(
            functools.partial(se_fused_kernel, hw_true=float(HW)),
            out_shape=jax.ShapeDtypeStruct((B, C, s_pad), x.dtype),
            grid=(B,),
            in_specs=[
                pl.BlockSpec((None, C, s_pad), lambda b: (b, 0, 0)),   # x
                pl.BlockSpec((C1, C), lambda b: (0, 0)),               # fc1 w
                pl.BlockSpec((C1, 1), lambda b: (0, 0)),               # fc1 b
                pl.BlockSpec((C, C1), lambda b: (0, 0)),               # fc2 w
                pl.BlockSpec((C, 1), lambda b: (0, 0)),                # fc2 b
            ],
            out_specs=pl.BlockSpec((None, C, s_pad), lambda b: (b, 0, 0)),
            compiler_params=pltpu.CompilerParams(
                dimension_semantics=("parallel",)),
            cost_estimate=ce,
        )(x_flat, w1f, b1c, w2f, b2c)

        if s_pad != HW:
            out_flat = out_flat[:, :, :HW]
        return out_flat.reshape(B, C, H, W)

    # ---------------- fallback: tiled two-pass ----------------
    tile_s = max(128, min((tile_s // 128) * 128, hw_pad128))
    s_pad = tile_s * pl.cdiv(HW, tile_s)
    n_tiles = s_pad // tile_s

    x_flat = x.reshape(B, C, HW)
    if s_pad != HW:
        x_flat = jnp.pad(x_flat, ((0, 0), (0, 0), (0, s_pad - HW)))

    ce_scale = pl.CostEstimate(
        flops=int(B * (C * s_pad + 2 * C1 * C + 2 * C * C1 + 2 * C)),
        transcendentals=int(B * C),
        bytes_accessed=int(B * C * s_pad * itemsize
                           + (C1 * C + C * C1 + C1 + C) * 4 + B * C * 4),
    )
    ce_apply = pl.CostEstimate(
        flops=int(B * C * s_pad),
        transcendentals=0,
        bytes_accessed=int(2 * B * C * s_pad * itemsize + B * C * 4),
    )

    scale = pl.pallas_call(
        functools.partial(se_scale_kernel, hw_true=float(HW)),
        out_shape=jax.ShapeDtypeStruct((B, C, 1), jnp.float32),
        grid=(B, n_tiles),
        in_specs=[
            pl.BlockSpec((None, C, tile_s), lambda b, s: (b, 0, s)),
            pl.BlockSpec((C1, C), lambda b, s: (0, 0)),
            pl.BlockSpec((C1, 1), lambda b, s: (0, 0)),
            pl.BlockSpec((C, C1), lambda b, s: (0, 0)),
            pl.BlockSpec((C, 1), lambda b, s: (0, 0)),
        ],
        out_specs=pl.BlockSpec((None, C, 1), lambda b, s: (b, 0, 0)),
        scratch_shapes=[pltpu.VMEM((C, 1), jnp.float32)],
        compiler_params=pltpu.CompilerParams(
            dimension_semantics=("parallel", "arbitrary")),
        cost_estimate=ce_scale,
    )(x_flat, w1f, b1c, w2f, b2c)

    out_flat = pl.pallas_call(
        se_apply_kernel,
        out_shape=jax.ShapeDtypeStruct((B, C, s_pad), x.dtype),
        grid=(B, n_tiles),
        in_specs=[
            pl.BlockSpec((None, C, tile_s), lambda b, s: (b, 0, s)),
            pl.BlockSpec((None, C, 1), lambda b, s: (b, 0, 0)),
        ],
        out_specs=pl.BlockSpec((None, C, tile_s), lambda b, s: (b, 0, s)),
        compiler_params=pltpu.CompilerParams(
            dimension_semantics=("parallel", "parallel")),
        cost_estimate=ce_apply,
    )(x_flat, scale)

    if s_pad != HW:
        out_flat = out_flat[:, :, :HW]
    return out_flat.reshape(B, C, H, W)


# -------------------------------- reference ---------------------------------
def se_reference(x, w1, b1, w2, b2):
    xf = x.astype(jnp.float32)
    pooled = jnp.mean(xf, axis=(2, 3))                         # (B, C)
    h = jax.nn.relu(pooled @ w1.astype(jnp.float32).T + b1[None, :])
    z = h @ w2.astype(jnp.float32).T + b2[None, :]             # (B, C)
    gate = jax.nn.sigmoid(z)[:, :, None, None]
    return (xf * gate).astype(x.dtype)


if __name__ == "__main__":
    # Channels must be >= reduction so C // 16 >= 1.
    B, C, H, W = 2, 64, 16, 16
    reduction = 16
    C1 = C // reduction  # 4

    key = jax.random.PRNGKey(0)
    kx, k1, k2, k3, k4 = jax.random.split(key, 5)
    x = jax.random.normal(kx, (B, C, H, W), dtype=jnp.float32)
    w1 = jax.random.normal(k1, (C1, C), dtype=jnp.float32) * 0.1
    b1 = jax.random.normal(k2, (C1,), dtype=jnp.float32) * 0.05
    w2 = jax.random.normal(k3, (C, C1), dtype=jnp.float32) * 0.1
    b2 = jax.random.normal(k4, (C,), dtype=jnp.float32) * 0.05

    ref = jax.block_until_ready(se_reference(x, w1, b1, w2, b2))

    # Fused single-pass path (default for these shapes).
    out = jax.block_until_ready(se_module(x, w1, b1, w2, b2))
    assert out.shape == (B, C, H, W)
    err = jnp.max(jnp.abs(out - ref))
    assert jnp.allclose(out, ref, rtol=1e-2, atol=1e-2), f"fused diff = {err}"

    # Two-pass tiled fallback (forced; exercises the cross-tile accumulator).
    out2 = jax.block_until_ready(
        se_module(x, w1, b1, w2, b2, tile_s=128, fused_vmem_budget=0))
    err2 = jnp.max(jnp.abs(out2 - ref))
    assert jnp.allclose(out2, ref, rtol=1e-2, atol=1e-2), f"tiled diff = {err2}"

    print("KERNEL_OK")
</pallas_src>

<mosaic_0001>
module attributes {stable_mosaic.version = 11 : i64} {
  func.func @se_fused_kernel(%arg0: i32, %arg1: memref<1x64x256xf32, #tpu.memory_space<vmem>>, %arg2: memref<4x64xf32, #tpu.memory_space<vmem>>, %arg3: memref<4x1xf32, #tpu.memory_space<vmem>>, %arg4: memref<64x4xf32, #tpu.memory_space<vmem>>, %arg5: memref<64x1xf32, #tpu.memory_space<vmem>>, %arg6: memref<1x64x256xf32, #tpu.memory_space<vmem>>) attributes {dimension_semantics = [#tpu.dimension_semantics<parallel>], iteration_bounds = array<i64: 2>, scalar_prefetch = 0 : i64, scratch_operands = 0 : i64, tpu.core_type = #tpu.core_type<tc>, window_params = [{transform_indices = @transform_0, window_bounds = array<i64: 1, 64, 256>}, {pipeline_mode = #tpu.pipeline_mode<synchronous>, transform_indices = @transform_1, window_bounds = array<i64: 4, 64>}, {pipeline_mode = #tpu.pipeline_mode<synchronous>, transform_indices = @transform_2, window_bounds = array<i64: 4, 1>}, {pipeline_mode = #tpu.pipeline_mode<synchronous>, transform_indices = @transform_3, window_bounds = array<i64: 64, 4>}, {pipeline_mode = #tpu.pipeline_mode<synchronous>, transform_indices = @transform_4, window_bounds = array<i64: 64, 1>}, {transform_indices = @transform_5, window_bounds = array<i64: 1, 64, 256>}]} {
    %c0 = arith.constant 0 : index
    %c0_0 = arith.constant 0 : index
    %c0_1 = arith.constant 0 : index
    %0 = vector.load %arg1[%c0, %c0_0, %c0_1] : memref<1x64x256xf32, #tpu.memory_space<vmem>>, vector<1x64x256xf32>
    %1 = vector.shape_cast %0 : vector<1x64x256xf32> to vector<64x256xf32>
    %cst = arith.constant dense<0.000000e+00> : vector<64xf32>
    %2 = vector.multi_reduction <add>, %1, %cst [1] : vector<64x256xf32> to vector<64xf32>
    %3 = vector.shape_cast %2 : vector<64xf32> to vector<64x1xf32>
    %cst_2 = arith.constant 3.906250e-03 : f32
    %4 = vector.broadcast %cst_2 : f32 to vector<64x1xf32>
    %5 = arith.mulf %3, %4 : vector<64x1xf32>
    %c0_3 = arith.constant 0 : index
    %c0_4 = arith.constant 0 : index
    %6 = vector.load %arg2[%c0_3, %c0_4] : memref<4x64xf32, #tpu.memory_space<vmem>>, vector<4x64xf32>
    %cst_5 = arith.constant dense<0.000000e+00> : vector<4x1xf32>
    %7 = tpu.matmul %6, %5, %cst_5 {dimension_numbers = #tpu.dot_dimension_numbers<[1], [0], [0], [1], [0, 0, 1, 1], [], []>} : vector<4x64xf32>, vector<64x1xf32>, vector<4x1xf32> -> vector<4x1xf32>
    %c0_6 = arith.constant 0 : index
    %c0_7 = arith.constant 0 : index
    %8 = vector.load %arg3[%c0_6, %c0_7] : memref<4x1xf32, #tpu.memory_space<vmem>>, vector<4x1xf32>
    %9 = arith.addf %7, %8 : vector<4x1xf32>
    %cst_8 = arith.constant 0.000000e+00 : f32
    %10 = vector.broadcast %cst_8 : f32 to vector<4x1xf32>
    %11 = arith.maximumf %9, %10 : vector<4x1xf32>
    %c0_9 = arith.constant 0 : index
    %c0_10 = arith.constant 0 : index
    %12 = vector.load %arg4[%c0_9, %c0_10] : memref<64x4xf32, #tpu.memory_space<vmem>>, vector<64x4xf32>
    %cst_11 = arith.constant dense<0.000000e+00> : vector<64x1xf32>
    %13 = tpu.matmul %12, %11, %cst_11 {dimension_numbers = #tpu.dot_dimension_numbers<[1], [0], [0], [1], [0, 0, 1, 1], [], []>} : vector<64x4xf32>, vector<4x1xf32>, vector<64x1xf32> -> vector<64x1xf32>
    %c0_12 = arith.constant 0 : index
    %c0_13 = arith.constant 0 : index
    %14 = vector.load %arg5[%c0_12, %c0_13] : memref<64x1xf32, #tpu.memory_space<vmem>>, vector<64x1xf32>
    %15 = arith.addf %13, %14 : vector<64x1xf32>
    %16 = arith.negf %15 : vector<64x1xf32>
    %17 = math.exp %16 : vector<64x1xf32>
    %cst_14 = arith.constant 1.000000e+00 : f32
    %18 = vector.broadcast %cst_14 : f32 to vector<64x1xf32>
    %19 = arith.addf %18, %17 : vector<64x1xf32>
    %20 = arith.divf %18, %19 : vector<64x1xf32>
    %21 = vector.broadcast %20 : vector<64x1xf32> to vector<64x256xf32>
    %22 = arith.mulf %1, %21 : vector<64x256xf32>
    %c0_15 = arith.constant 0 : index
    %c0_16 = arith.constant 0 : index
    %c0_17 = arith.constant 0 : index
    %23 = vector.load %arg6[%c0_15, %c0_16, %c0_17] : memref<1x64x256xf32, #tpu.memory_space<vmem>>, vector<1x64x256xf32>
    %24 = vector.shape_cast %23 : vector<1x64x256xf32> to vector<64x256xf32>
    %25 = vector.shape_cast %22 : vector<64x256xf32> to vector<1x64x256xf32>
    tpu.vector_store %arg6[%c0_15, %c0_16, %c0_17], %25 {strides = array<i32>} : memref<1x64x256xf32, #tpu.memory_space<vmem>>, vector<1x64x256xf32>,
    return
  }
  func.func @transform_0(%arg0: i32) -> (i32, i32, i32) {
    %c0_i32 = arith.constant 0 : i32
    %c0_i32_0 = arith.constant 0 : i32
    %c0_i32_1 = arith.constant 0 : i32
    return %arg0, %c0_i32, %c0_i32_0 : i32, i32, i32
  }
  func.func @transform_1(%arg0: i32) -> (i32, i32) {
    %c0_i32 = arith.constant 0 : i32
    %c0_i32_0 = arith.constant 0 : i32
    %c0_i32_1 = arith.constant 0 : i32
    return %c0_i32, %c0_i32_0 : i32, i32
  }
  func.func @transform_2(%arg0: i32) -> (i32, i32) {
    %c0_i32 = arith.constant 0 : i32
    %c0_i32_0 = arith.constant 0 : i32
    %c0_i32_1 = arith.constant 0 : i32
    return %c0_i32, %c0_i32_0 : i32, i32
  }
  func.func @transform_3(%arg0: i32) -> (i32, i32) {
    %c0_i32 = arith.constant 0 : i32
    %c0_i32_0 = arith.constant 0 : i32
    %c0_i32_1 = arith.constant 0 : i32
    return %c0_i32, %c0_i32_0 : i32, i32
  }
  func.func @transform_4(%arg0: i32) -> (i32, i32) {
    %c0_i32 = arith.constant 0 : i32
    %c0_i32_0 = arith.constant 0 : i32
    %c0_i32_1 = arith.constant 0 : i32
    return %c0_i32, %c0_i32_0 : i32, i32
  }
  func.func @transform_5(%arg0: i32) -> (i32, i32, i32) {
    %c0_i32 = arith.constant 0 : i32
    %c0_i32_0 = arith.constant 0 : i32
    %c0_i32_1 = arith.constant 0 : i32
    return %arg0, %c0_i32, %c0_i32_0 : i32, i32, i32
  }
}

</mosaic_0001>

<bundles_post_ra>
// kernel: tpu_custom_call.1
= control target key start
LH: loop header
LB: loop body
LE: loop exit
PB: predicated region body
PF: predicated region fallthrough
CT: control target
= control target key end

     0   :  { %10 = vsyncpa [#allocation3], 0  ;;  %s1314_s0 = inlined_call_operand.hbm [shape: f32[2,64,256], index: 0, kind: input, shape index: {}]   ;;  %s1315_s1 = inlined_call_operand.vmem [shape: f32[4,64], index: 1, kind: input, shape index: {}]   ;;  %s1316_s2 = inlined_call_operand.vmem [shape: f32[4,1], index: 2, kind: input, shape index: {}]   ;;  %s1317_s3 = inlined_call_operand.vmem [shape: f32[64,4], index: 3, kind: input, shape index: {}]   ;;  %s1318_s4 = inlined_call_operand.vmem [shape: f32[64,1], index: 4, kind: input, shape index: {}]   ;;  %s1319_s5 = inlined_call_operand.hbm [shape: f32[2,64,256], index: 5, kind: output, shape index: {}]  }
   0x1   :  { %12 = vsyncpa [#allocation3 + $0x1], 0 }
   0x2   :  { %13 = vsyncpa [#allocation4], 0 }
   0x3   :  { %15 = vsyncpa [#allocation4 + $0x1], 0  ;;  %s974_s18 = smov 0   ;;  %s976_s19 = smov 0  }
   0x4   :  { %s978_s20 = smov 0   ;;  %s980_s21 = smov 0  }
   0x5 LB: > { %s995_s22 = sadd.s32 4294967295, %s937_s21   ;;  %s719_s23 = sadd.s32 4294967294, %s937_s21   ;;  %s937_s21 = sphi %s980_s21, %s1331_s21   ;;  %s933_s20 = sphi %s978_s20, %s1330_s20   ;;  %s929_s19 = sphi %s976_s19, %s1329_s19   ;;  %s925_s18 = sphi %s974_s18, %s1328_s18  }
   0x6   : > { %s999_s24 = sadd.s32 1, %s937_s21   ;;  %s28_s25 = sadd.s32 1, %s933_s20 }
   0x7   : > { %s25_s26 = ssub.s32 %s937_s21, %s999_s24  ;;  %p35_p0 = scmp.ne.s32.totalorder %s933_s20, %s929_s19 }
   0x8   : > { %p26_p1 = scmp.eq.s32.totalorder %s25_s26, 0  ;;  %p36_p2 = scmp.eq.s32.totalorder %s937_s21, 0 }
   0x9   : > { %p41_p3 = scmp.ne.s32.totalorder %s929_s19, %s925_s18  ;;  %p42_p4 = scmp.eq.s32.totalorder %s995_s22, 0 }
   0xa   : > { %s1011_s27 = scalar_select %p26_p1, %s933_s20, %s28_s25  }
   0xb   : > { %p1013_p5 = por %p36_p2, %p35_p0  ;;  %p1017_p6 = por %p42_p4, %p41_p3 }
   0xc   : > { %p149_p7 = scmp.eq.s32.totalorder %s995_s22, 1  ;;  %p155_p8 = scmp.eq.s32.totalorder %s719_s23, 1 }
   0xd   : > { %p767_p10 = scmp.lt.s32.totalorder %s937_s21, 2  ;;  %s187_s7 = sand.u32 1, %s933_s20  }
   0xe   : > { %p1024_p11 = por %p149_p7, %p35_p0  ;;  %p1028_p12 = por %p155_p8, %p41_p3 }
   0xf   : > { %s751_s8 = sshll.u32 %s937_s21, 7  ;;  %s722_s9 = sshll.u32 %s187_s7, 7 }
  0x10   : > { %s196_s12 = scalar_lea.hbm %s1314_s0, %s751_s8  ;;  %s191_s14 = scalar_lea.vmem [#allocation2], %s722_s9 }
  0x11   : > { %s197_s13 = sshll.u32 %s196_s12, 4  ;;  %s199_s15 = sshll.u32 %s191_s14, 4  ;;  %s198_s13 = int_to_ptr.hbm [resolvable:$true] %s197_s13  ;;  %s200_s15 = int_to_ptr.vmem [resolvable:$true] %s199_s15 }
  0x12   : > { %p1039_p13 = pnand %p767_p10, %p1013_p5  ;;  %p725_p0 = scmp.ge.s32.totalorder %s937_s21, 1 }
  0x13   : > { %p207_p1 = scmp.lt.s32.totalorder %s937_s21, 3  ;;  %s188_s17 = scalar_lea.sflag [#allocation3], %s187_s7 }
  0x14   : > { %s841_s23 = sshra.s32 %s198_s13, 4  ;;  %p845_p3 = pneg %p1039_p13  ;;  %s842_s23 = int_to_ptr.hbm [resolvable:$true] %s841_s23 }
  0x15   : > { %s843_s25 = scalar_lea.hbm %s842_s23, 128  ;;  %s848_s28 = scalar_lea.hbm %s1314_s0, 256 }
  0x16   : > { %p844_p2 = scmp.ne.s32.totalorder %s842_s23, %s843_s25  ;;  %p849_p5 = scmp.lt.s32.totalorder %s842_s23, %s1314_s0 }
  0x17   : > { %p850_p8 = scmp.lt.s32.totalorder %s848_s28, %s843_s25 }
  0x18   : > { %p846_p4 = pnand %p845_p3, %p844_p2 }
  0x19   : > { %p851_p10 = por %p850_p8, %p849_p5 }
  0x1a   : > { %p847_p7 = pneg %p846_p4 }
  0x1c   : > { %p852_p9 = pnand %p851_p10, %p847_p7 }
  0x1e   : > { %855 = shalt.err (!%p852_p9)
}
  0x1f   : > { %s939_s7 = smov 256   ;;  %s940_s11 = smov 16  }
  0x20   : > { %762 = dma.hbm_to_vmem [thread:$0]  (!%p1039_p13), %s198_s13, 2048, %s200_s15, %s188_s17, %s939_s7, %s939_s7, %s940_s11  }
  0x21   : > { %p208_p2 = pnand %p725_p0, %p207_p1 }
  0x22   : > { %s1060_s12 = sand.u32 (!%p208_p2), 1, %s929_s19  }
  0x23   : > { %211 = sbr.rel (%p208_p2) target bundleno = 626 (0x272), region = 40  ;;  %s726_s14 = sshll.u32 (!%p208_p2), %s1060_s12, 7 }
  0x24   : > { %s214_s23 = scalar_lea.sflag (!%p208_p2), [#allocation3], %s1060_s12  ;;  %s217_s25 = scalar_lea.vmem (!%p208_p2), [#allocation2], %s726_s14 }
  0x28   : > { %916 = dma.done.wait (%p1017_p6), %s214_s23, 2048  }
  0x29   : > { %918 = vsyncadd (%p1017_p6), %s214_s23, 4294965248  ;;  %v1070_v0 = vld [vmem:[%s217_s25 + $0x70] sm:$0xff]  ;;  %v1072_v1 = vld [vmem:[%s217_s25 + $0x78] sm:$0xff]  ;;  %vm295_vm0 = vcmask 523264   ;;  %vm361_vm1 = vcmask 1043456   ;;  %vm336_vm2 = vcmask 31744  }
  0x2a   : > { %v1074_v2 = vld [vmem:[%s217_s25 + $0x50] sm:$0xff]  ;;  %v282_v3 = vadd.f32 %v1072_v1, %v1070_v0  ;;  %v1078_v4 = vld [vmem:[%s217_s25 + $0x58] sm:$0xff]  ;;  %v1088_v9 = vld [vmem:[%s217_s25 + $0x60] sm:$0xff]  ;;  %v941_v55 = vmov 0   ;;  %s1248_s9 = scalar_lea.vmem [#allocation5], %s726_s14  ;;  %s752_s14 = sshll.u32 %s995_s22, 7 }
  0x2b   : > { %v276_v5 = vadd.f32 %v1078_v4, %v1074_v2  ;;  %v1082_v6 = vld [vmem:[%s217_s25 + $0x30] sm:$0xff]  ;;  %v1084_v7 = vld [vmem:[%s217_s25 + $0x38] sm:$0xff]  ;;  %v1090_v10 = vld [vmem:[%s217_s25 + $0x68] sm:$0xff]  ;;  %806 = vset.pattern.permute.xlu2 %v941_v55  ;;  %807 = vset.pattern.permute.xlu0 %v941_v55  ;;  %s642_s11 = scalar_lea.hbm %s1319_s5, %s752_s14  ;;  %s643_s23 = sshll.u32 %s1248_s9, 4  ;;  %s644_s23 = int_to_ptr.vmem [resolvable:$true] %s643_s23 }
  0x2c   : > { %283 = vadd.xlane.f32.xlu0 %v282_v3  ;;  %v270_v8 = vadd.f32 %v1084_v7, %v1082_v6  ;;  %v1092_v11 = vld [vmem:[%s217_s25 + $0x40] sm:$0xff]  ;;  %v1094_v12 = vld [vmem:[%s217_s25 + $0x48] sm:$0xff]  ;;  %v279_v15 = vadd.f32 %v1090_v10, %v1088_v9  ;;  %v1106_v18 = vld [vmem:[%s217_s25 + $0x10] sm:$0xff]  ;;  %808 = vset.pattern.permute.xlu1 %v941_v55  ;;  %s631_s22 = scalar_lea.sflag [#allocation4], %s1060_s12  ;;  %s891_s17 = scalar_lea.hbm %s1319_s5, 256 }
  0x2d   : > { %277 = vadd.xlane.f32.xlu1 %v276_v5  ;;  %v1096_v13 = vld [vmem:[%s217_s25 + $0x20] sm:$0xff]  ;;  %v1098_v14 = vld [vmem:[%s217_s25 + $0x28] sm:$0xff]  ;;  %v273_v16 = vadd.f32 %v1094_v12, %v1092_v11  ;;  %v1108_v19 = vld [vmem:[%s217_s25 + $0x18] sm:$0xff] }
  0x2e   : > { %271 = vadd.xlane.f32.xlu2 %v270_v8  ;;  %v267_v17 = vadd.f32 %v1098_v14, %v1096_v13  ;;  %v1110_v20 = vld [vmem:[%s217_s25] sm:$0xff]  ;;  %v1112_v21 = vld [vmem:[%s217_s25 + $0x8] sm:$0xff]  ;;  %v264_v22 = vadd.f32 %v1108_v19, %v1106_v18  ;;  %v323_v46 = vld [vmem:[%s1317_s3 + $0x18] sm:$0xff]  ;;  %s645_s25 = sshll.u32 %s642_s11, 4  ;;  %s646_s25 = int_to_ptr.hbm [resolvable:$true] %s645_s25 }
  0x2f   : > { %v261_v23 = vadd.f32 %v1112_v21, %v1110_v20  ;;  %v293_v40 = vld [vmem:[%s1315_s1] sm:$0xf]  ;;  %v326_v47 = vld [vmem:[%s1317_s3 + $0x30] sm:$0xff]  ;;  %v321_v48 = vld [vmem:[%s1317_s3 + $0x8] sm:$0xff]  ;;  %s885_s29 = sshra.s32 %s646_s25, 4  ;;  %s886_s29 = int_to_ptr.hbm [resolvable:$true] %s885_s29 }
  0x30   : > { %v294_v41 = vld [vmem:[%s1316_s2] sm:$0xf]  ;;  %v327_v50 = vld [vmem:[%s1317_s3 + $0x38] sm:$0xff]  ;;  %v322_v51 = vld [vmem:[%s1317_s3 + $0x10] sm:$0xff]  ;;  %s887_s13 = scalar_lea.hbm %s886_s29, 128  ;;  %p892_p0 = scmp.lt.s32.totalorder %s886_s29, %s1319_s5 }
  0x31   : > { %v320_v45 = vld [vmem:[%s1317_s3] sm:$0xff]  ;;  %v325_v52 = vld [vmem:[%s1317_s3 + $0x28] sm:$0xff]  ;;  %v331_v58 = vld [vmem:[%s1318_s4 + $0x18] sm:$0xff]  ;;  %p888_p6 = scmp.ne.s32.totalorder %s886_s29, %s887_s13  ;;  %p893_p1 = scmp.lt.s32.totalorder %s891_s17, %s887_s13 }
  0x32   : > { %v324_v49 = vld [vmem:[%s1317_s3 + $0x20] sm:$0xff]  ;;  %v334_v59 = vld [vmem:[%s1318_s4 + $0x30] sm:$0xff]  ;;  %v329_v60 = vld [vmem:[%s1318_s4 + $0x8] sm:$0xff] }
  0x33   : > { %v328_v53 = vld [vmem:[%s1318_s4] sm:$0xff]  ;;  %p889_p9 = pnand %p888_p6, %p1024_p11  ;;  %p894_p3 = por %p893_p1, %p892_p0 }
  0x34   : > { %280 = vadd.xlane.f32.xlu0 %v279_v15 }
  0x35   : > { %274 = vadd.xlane.f32.xlu1 %v273_v16  ;;  %p890_p13 = pneg %p889_p9 }
  0x36   : > { %268 = vadd.xlane.f32.xlu2 %v267_v17 }
  0x37   : > { %p895_p4 = pnand %p894_p3, %p890_p13 }
  0x3c   : > { %265 = vadd.xlane.f32.xlu0 %v264_v22 }
  0x3d   : > { %262 = vadd.xlane.f32.xlu1 %v261_v23 }
  0x9f   : > { %v284_v24 = vpop.xlane.xlu0 %283 }
  0xa0   : > { %v292_v25 = vmul.f32 0.00390625, %v284_v24  ;;  %v278_v26 = vpop.xlane.xlu1 %277  ;;  %v332_v24 = vld [vmem:[%s1318_s4 + $0x20] sm:$0xff] }
  0xa1   : > { %v272_v27 = vpop.xlane.xlu2 %271  ;;  %v290_v31 = vmul.f32 0.00390625, %v278_v26  ;;  %v335_v26 = vld [vmem:[%s1318_s4 + $0x38] sm:$0xff] }
  0xa2   : > { %307 = vmatpush.msra.mxu0 %v292_v25  ;;  %v288_v34 = vmul.f32 0.00390625, %v272_v27  ;;  %v330_v25 = vld [vmem:[%s1318_s4 + $0x10] sm:$0xff] }
  0xa7   : > { %v281_v28 = vpop.xlane.xlu0 %280 }
  0xa8   : > { %v291_v29 = vmul.f32 0.00390625, %v281_v28  ;;  %v275_v30 = vpop.xlane.xlu1 %274 }
  0xa9   : > { %v289_v32 = vmul.f32 0.00390625, %v275_v30  ;;  %v269_v33 = vpop.xlane.xlu2 %268 }
  0xaa   : > { %308 = vmatpush.msra.mxu0 %v291_v29  ;;  %v287_v35 = vmul.f32 0.00390625, %v269_v33 }
  0xac   : > { %309 = vmatpush.msra.mxu0 %v290_v31 }
  0xae   : > { %310 = vmatpush.msra.mxu0 %v289_v32 }
  0xaf   : > { %v266_v36 = vpop.xlane.xlu0 %265 }
  0xb0   : > { %311 = vmatpush.msra.mxu0 %v288_v34  ;;  %v286_v37 = vmul.f32 0.00390625, %v266_v36  ;;  %v263_v38 = vpop.xlane.xlu1 %262 }
  0xb1   : > { %v285_v39 = vmul.f32 0.00390625, %v263_v38 }
  0xb2   : > { %312 = vmatpush.msra.mxu0 %v287_v35 }
  0xb4   : > { %313 = vmatpush.msra.mxu0 %v286_v37 }
  0xb6   : > { %314 = vmatpush.msra.mxu0 %v285_v39 }
  0xb7   : > { %728 = vmatmul.msk.f32.vlgmr.msra.gmra.mxu0 %vm295_vm0, %v293_v40 }
 0x134   : > { %v316_v42 = vpop.f32.mrf.mxu0 }
 0x135   : > { %v317_v43 = vadd.f32 %v316_v42, %v294_v41  ;;  %v333_v42 = vld [vmem:[%s1318_s4 + $0x28] sm:$0xff] }
 0x137   : > { %v319_v44 = vmax.f32 %v317_v43, 0.0 }
 0x139   : > { %729 = vmatpush.msk.msra.mxu1 %vm361_vm1, %v319_v44  ;;  %753 = vmatpush.msk.msra.mxu2 %vm361_vm1, %v319_v44 }
 0x13a   : > { %754 = vmatpush.msk.msra.mxu3 %vm361_vm1, %v319_v44  ;;  %730 = vmatmul.msk.f32.vlgmr.msra.gmra.mxu1 %vm336_vm2, %v320_v45 }
 0x13b   : > { %733 = vmatmul.msk.f32.vlgmr.msra.gmra.mxu2 %vm336_vm2, %v323_v46  ;;  %736 = vmatmul.msk.f32.vlgmr.msra.gmra.mxu3 %vm336_vm2, %v326_v47 }
 0x142   : > { %731 = vmatmul.msk.f32.gmra.mxu1 %vm336_vm2, %v321_v48 }
 0x143   : > { %734 = vmatmul.msk.f32.gmra.mxu2 %vm336_vm2, %v324_v49  ;;  %737 = vmatmul.msk.f32.gmra.mxu3 %vm336_vm2, %v327_v50 }
 0x14a   : > { %732 = vmatmul.msk.f32.gmra.mxu1 %vm336_vm2, %v322_v51 }
 0x14b   : > { %735 = vmatmul.msk.f32.gmra.mxu2 %vm336_vm2, %v325_v52 }
 0x1b7   : > { %v382_v54 = vpop.f32.mrf.mxu1 }
 0x1b8   : > { %v383_v56 = vadd.f32 %v382_v54, %v328_v53 }
 0x1ba   : > { %v738_v57 = vmul.f32 -1.442695, %v383_v56 }
 0x1bc   : > { %809 = vpow2.f32 %v738_v57 }
 0x1be   : > { %v391_v61 = vpop.f32.mrf.mxu2  ;;  %v400_v62 = vpop.f32.mrf.mxu3 }
 0x1bf   : > { %v392_v63 = vadd.f32 %v391_v61, %v331_v58  ;;  %v385_v3 = vpop.f32.mrf.mxu1  ;;  %v401_v5 = vadd.f32 %v400_v62, %v334_v59 }
 0x1c0   : > { %v386_v8 = vadd.f32 %v385_v3, %v329_v60 }
 0x1c1   : > { %v741_v15 = vmul.f32 -1.442695, %v392_v63  ;;  %v744_v22 = vmul.f32 -1.442695, %v401_v5 }
 0x1c2   : > { %v810_v16 = vpop.eup %809  ;;  %v739_v17 = vmul.f32 -1.442695, %v386_v8 }
 0x1c3   : > { %v430_v23 = vadd.f32 1.0, %v810_v16  ;;  %811 = vpow2.f32 %v741_v15 }
 0x1c4   : > { %813 = vpow2.f32 %v739_v17 }
 0x1c5   : > { %815 = vrcp.f32 %v430_v23  ;;  %v449_v48 = vand.u32 2147483648, %v430_v23  ;;  %v447_v50 = vand.u32 2147483647, %v430_v23  ;;  %vm443_vm4 = vweird.f32 %v430_v23 }
 0x1c6   : > { %817 = vpow2.f32 %v744_v22  ;;  %v394_v27 = vpop.f32.mrf.mxu2  ;;  %v403_v28 = vpop.f32.mrf.mxu3 }
 0x1c7   : > { %v395_v29 = vadd.f32 %v394_v27, %v332_v24  ;;  %v388_v30 = vpop.f32.mrf.mxu1  ;;  %v404_v32 = vadd.f32 %v403_v28, %v335_v26  ;;  %v450_v57 = vor.u32 1.1754944e-38, %v449_v48  ;;  %vm448_vm6 = vcmp.eq.f32.partialorder %v447_v50, 8.507059e+37 }
 0x1c8   : > { %v389_v31 = vadd.f32 %v388_v30, %v330_v25 }
 0x1c9   : > { %v812_v33 = vpop.eup %811  ;;  %v742_v34 = vmul.f32 -1.442695, %v395_v29  ;;  %v745_v41 = vmul.f32 -1.442695, %v404_v32 }
 0x1ca   : > { %v814_v35 = vpop.eup %813  ;;  %v1177_v36 = vadd.f32 1.0, %v812_v33  ;;  %v740_v37 = vmul.f32 -1.442695, %v389_v31 }
 0x1cb   : > { %v816_v38 = vpop.eup %815  ;;  %v1179_v39 = vadd.f32 1.0, %v814_v35  ;;  %819 = vpow2.f32 %v742_v34 }
 0x1cc   : > { %v818_v40 = vpop.eup %817  ;;  %821 = vrcp.f32 %v1177_v36  ;;  %v439_v43 = vmul.f32 %v816_v38, %v430_v23  ;;  %vm444_vm3 = vweird.f32 %v816_v38  ;;  %v494_v16 = vand.u32 2147483648, %v1177_v36 }
 0x1cd   : > { %823 = vrcp.f32 %v1179_v39  ;;  %v1186_v44 = vadd.f32 1.0, %v818_v40  ;;  %vm445_vm5 = vmor %vm443_vm4, %vm444_vm3  ;;  %v464_v15 = vand.u32 2147483648, %v1179_v39  ;;  %v462_v25 = vand.u32 2147483647, %v1179_v39 }
 0x1ce   : > { %825 = vpow2.f32 %v740_v37  ;;  %v397_v45 = vpop.f32.mrf.mxu2  ;;  %v440_v46 = vsub.f32 1.0, %v439_v43  ;;  %v492_v26 = vand.u32 2147483647, %v1177_v36  ;;  %vm458_vm9 = vweird.f32 %v1179_v39 }
 0x1cf   : > { %v398_v47 = vadd.f32 %v397_v45, %v333_v42  ;;  %827 = vpow2.f32 %v745_v41  ;;  %vm488_vm10 = vweird.f32 %v1177_v36  ;;  %v465_v32 = vor.u32 1.1754944e-38, %v464_v15 }
 0x1d0   : > { %v441_v49 = vmul.f32 %v816_v38, %v440_v46  ;;  %829 = vrcp.f32 %v1186_v44  ;;  %v495_v35 = vor.u32 1.1754944e-38, %v494_v16  ;;  %vm463_vm13 = vcmp.eq.f32.partialorder %v462_v25, 8.507059e+37 }
 0x1d1   : > { %v820_v51 = vpop.eup %819  ;;  %v743_v52 = vmul.f32 -1.442695, %v398_v47  ;;  %vm493_vm14 = vcmp.eq.f32.partialorder %v492_v26, 8.507059e+37  ;;  %vm533_vm1 = vweird.f32 %v1186_v44  ;;  %v537_v15 = vand.u32 2147483647, %v1186_v44 }
 0x1d2   : > { %v822_v53 = vpop.eup %821  ;;  %v1189_v54 = vadd.f32 1.0, %v820_v51  ;;  %v442_v55 = vadd.f32 %v816_v38, %v441_v49 }
 0x1d3   : > { %v824_v56 = vpop.eup %823  ;;  %831 = vpow2.f32 %v743_v52  ;;  %v484_v58 = vmul.f32 %v822_v53, %v1177_v36  ;;  %vm489_vm7 = vweird.f32 %v822_v53 }
 0x1d4   : > { %v826_v59 = vpop.eup %825  ;;  %833 = vrcp.f32 %v1189_v54  ;;  %v446_v60 = vsel %vm445_vm5, %v816_v38, %v442_v55  ;;  %v454_v61 = vmul.f32 %v824_v56, %v1179_v39  ;;  %vm459_vm8 = vweird.f32 %v824_v56  ;;  %vm490_vm11 = vmor %vm488_vm10, %vm489_vm7 }
 0x1d5   : > { %v1194_v62 = vadd.f32 1.0, %v826_v59  ;;  %v451_v63 = vsel %vm448_vm6, %v450_v57, %v446_v60  ;;  %v485_v3 = vsub.f32 1.0, %v484_v58  ;;  %v828_v5 = vpop.eup %827  ;;  %vm460_vm12 = vmor %vm458_vm9, %vm459_vm8  ;;  %v509_v46 = vand.u32 2147483648, %v1189_v54 }
 0x1d6   : > { %560 = vperm.xlu2 %806, %v451_v63   ;;  %v455_v8 = vsub.f32 1.0, %v454_v61  ;;  %v1198_v17 = vpop.eup %829  ;;  %v1201_v22 = vadd.f32 1.0, %v828_v5  ;;  %v507_v48 = vand.u32 2147483647, %v1189_v54  ;;  %vm503_vm0 = vweird.f32 %v1189_v54 }
 0x1d7   : > { %835 = vrcp.f32 %v1194_v62  ;;  %v486_v23 = vmul.f32 %v822_v53, %v485_v3  ;;  %v529_v33 = vmul.f32 %v1198_v17, %v1186_v44  ;;  %v479_v50 = vand.u32 2147483648, %v1194_v62 }
 0x1d8   : > { %v456_v24 = vmul.f32 %v824_v56, %v455_v8  ;;  %837 = vrcp.f32 %v1201_v22  ;;  %v477_v55 = vand.u32 2147483647, %v1194_v62  ;;  %vm473_vm4 = vweird.f32 %v1194_v62 }
 0x1d9   : > { %v832_v27 = vpop.eup %831  ;;  %v487_v28 = vadd.f32 %v822_v53, %v486_v23  ;;  %v530_v43 = vsub.f32 1.0, %v529_v33  ;;  %v510_v58 = vor.u32 1.1754944e-38, %v509_v46  ;;  %vm508_vm5 = vcmp.eq.f32.partialorder %v507_v48, 8.507059e+37 }
 0x1da   : > { %v834_v29 = vpop.eup %833  ;;  %v1207_v30 = vadd.f32 1.0, %v832_v27  ;;  %v457_v31 = vadd.f32 %v824_v56, %v456_v24  ;;  %vm534_vm6 = vweird.f32 %v1198_v17  ;;  %v480_v61 = vor.u32 1.1754944e-38, %v479_v50 }
 0x1db   : > { %v491_v34 = vsel %vm490_vm11, %v822_v53, %v487_v28  ;;  %v499_v37 = vmul.f32 %v834_v29, %v1189_v54  ;;  %vm504_vm15 = vweird.f32 %v834_v29  ;;  %v539_v5 = vand.u32 2147483648, %v1186_v44  ;;  %vm1231_vm9 = vmor %vm533_vm1, %vm534_vm6 }
 0x1dc   : > { %839 = vrcp.f32 %v1207_v30  ;;  %v461_v38 = vsel %vm460_vm12, %v824_v56, %v457_v31  ;;  %v496_v40 = vsel %vm493_vm14, %v495_v35, %v491_v34  ;;  %vm505_vm3 = vmor %vm503_vm0, %vm504_vm15  ;;  %v531_v56 = vmul.f32 %v1198_v17, %v530_v43 }
 0x1dd   : > { %v836_v36 = vpop.eup %835  ;;  %v466_v39 = vsel %vm463_vm13, %v465_v32, %v461_v38  ;;  %v500_v41 = vsub.f32 1.0, %v499_v37  ;;  %vm478_vm8 = vcmp.eq.f32.partialorder %v477_v55, 8.507059e+37  ;;  %v524_v27 = vand.u32 2147483648, %v1207_v30 }
 0x1de   : > { %565 = vperm.xlu0 %807, %v466_v39   ;;  %575 = vperm.xlu2 %806, %v496_v40   ;;  %v469_v42 = vmul.f32 %v836_v36, %v1194_v62  ;;  %v838_v49 = vpop.eup %837  ;;  %vm474_vm2 = vweird.f32 %v836_v36  ;;  %v532_v62 = vadd.f32 %v1198_v17, %v531_v56  ;;  %v540_v28 = vor.u32 1.1754944e-38, %v539_v5 }
 0x1df   : > { %v501_v45 = vmul.f32 %v834_v29, %v500_v41  ;;  %v544_v54 = vmul.f32 %v838_v49, %v1201_v22  ;;  %vm475_vm7 = vmor %vm473_vm4, %vm474_vm2  ;;  %vm518_vm11 = vweird.f32 %v1207_v30  ;;  %vm538_vm12 = vcmp.eq.f32.partialorder %v537_v15, 8.507059e+37 }
 0x1e0   : > { %v470_v47 = vsub.f32 1.0, %v469_v42  ;;  %v536_v31 = vsel %vm1231_vm9, %v1198_v17, %v532_v62  ;;  %v525_v33 = vor.u32 1.1754944e-38, %v524_v27  ;;  %vm548_vm15 = vweird.f32 %v1201_v22 }
 0x1e1   : > { %v502_v51 = vadd.f32 %v834_v29, %v501_v45  ;;  %v545_v25 = vsub.f32 1.0, %v544_v54  ;;  %v541_v34 = vsel %vm538_vm12, %v540_v28, %v536_v31  ;;  %vm549_vm0 = vweird.f32 %v838_v49 }
 0x1e2   : > { %v840_v52 = vpop.eup %839  ;;  %v471_v53 = vmul.f32 %v836_v36, %v470_v47  ;;  %v554_v37 = vand.u32 2147483648, %v1201_v22  ;;  %v552_v38 = vand.u32 2147483647, %v1201_v22  ;;  %vm550_vm1 = vmor %vm548_vm15, %vm549_vm0 }
 0x1e3   : > { %v506_v57 = vsel %vm505_vm3, %v834_v29, %v502_v51  ;;  %v514_v59 = vmul.f32 %v840_v52, %v1207_v30  ;;  %vm519_vm10 = vweird.f32 %v840_v52  ;;  %v522_v29 = vand.u32 2147483647, %v1207_v30 }
 0x1e4   : > { %v472_v60 = vadd.f32 %v836_v36, %v471_v53  ;;  %v511_v63 = vsel %vm508_vm5, %v510_v58, %v506_v57  ;;  %vm520_vm13 = vmor %vm518_vm11, %vm519_vm10  ;;  %v546_v32 = vmul.f32 %v838_v49, %v545_v25  ;;  %v555_v17 = vor.u32 1.1754944e-38, %v554_v37 }
 0x1e5   : > { %v515_v3 = vsub.f32 1.0, %v514_v59  ;;  %vm523_vm14 = vcmp.eq.f32.partialorder %v522_v29, 8.507059e+37  ;;  %vm553_vm2 = vcmp.eq.f32.partialorder %v552_v38, 8.507059e+37 }
 0x1e6   : > { %v476_v8 = vsel %vm475_vm7, %v836_v36, %v472_v60  ;;  %580 = vperm.xlu2 %806, %v511_v63   ;;  %v547_v30 = vadd.f32 %v838_v49, %v546_v32 }
 0x1e7   : > { %v481_v16 = vsel %vm478_vm8, %v480_v61, %v476_v8  ;;  %v516_v23 = vmul.f32 %v840_v52, %v515_v3 }
 0x1e8   : > { %570 = vperm.xlu1 %808, %v481_v16   ;;  %v551_v36 = vsel %vm550_vm1, %v838_v49, %v547_v30 }
 0x1e9   : > { %v517_v26 = vadd.f32 %v840_v52, %v516_v23  ;;  %v556_v39 = vsel %vm553_vm2, %v555_v17, %v551_v36 }
 0x1eb   : > { %v521_v44 = vsel %vm520_vm13, %v840_v52, %v517_v26 }
 0x1ec   : > { %v526_v35 = vsel %vm523_vm14, %v525_v33, %v521_v44 }
 0x1ee   : > { %590 = vperm.xlu2 %806, %v541_v34  }
 0x1f0   : > { %585 = vperm.xlu1 %808, %v526_v35  }
 0x1f8   : > { %595 = vperm.xlu1 %808, %v556_v39  }
 0x230   : > { %v561_v40 = vpop.permute.xlu2 %560 }
 0x231   : > { %v598_v41 = vmul.f32 %v561_v40, %v1110_v20  ;;  %v599_v42 = vmul.f32 %v561_v40, %v1112_v21 }
 0x233   : > { %614 = vst [vmem:[%s1248_s9] sm:$0xff] %v598_v41 }
 0x234   : > { %615 = vst [vmem:[%s1248_s9 + $0x8] sm:$0xff] %v599_v42 }
 0x238   : > { %v576_v22 = vpop.permute.xlu2 %575 }
 0x239   : > { %v604_v43 = vmul.f32 %v576_v22, %v1082_v6  ;;  %v605_v20 = vmul.f32 %v576_v22, %v1084_v7 }
 0x23b   : > { %620 = vst [vmem:[%s1248_s9 + $0x30] sm:$0xff] %v604_v43 }
 0x23c   : > { %621 = vst [vmem:[%s1248_s9 + $0x38] sm:$0xff] %v605_v20 }
 0x240   : > { %v581_v21 = vpop.permute.xlu2 %580 }
 0x241   : > { %v606_v45 = vmul.f32 %v581_v21, %v1092_v11  ;;  %v607_v46 = vmul.f32 %v581_v21, %v1094_v12 }
 0x243   : > { %622 = vst [vmem:[%s1248_s9 + $0x40] sm:$0xff] %v606_v45 }
 0x244   : > { %623 = vst [vmem:[%s1248_s9 + $0x48] sm:$0xff] %v607_v46 }
 0x248   : > { %v591_v47 = vpop.permute.xlu2 %590 }
 0x249   : > { %v610_v48 = vmul.f32 %v591_v47, %v1088_v9  ;;  %v611_v6 = vmul.f32 %v591_v47, %v1090_v10 }
 0x24b   : > { %626 = vst [vmem:[%s1248_s9 + $0x60] sm:$0xff] %v610_v48 }
 0x24c   : > { %627 = vst [vmem:[%s1248_s9 + $0x68] sm:$0xff] %v611_v6 }
 0x250   : > { %v566_v7 = vpop.permute.xlu0 %565 }
 0x251   : > { %v600_v49 = vmul.f32 %v566_v7, %v1106_v18  ;;  %v601_v11 = vmul.f32 %v566_v7, %v1108_v19 }
 0x253   : > { %616 = vst [vmem:[%s1248_s9 + $0x10] sm:$0xff] %v600_v49 }
 0x254   : > { %617 = vst [vmem:[%s1248_s9 + $0x18] sm:$0xff] %v601_v11 }
 0x25a   : > { %v571_v12 = vpop.permute.xlu1 %570 }
 0x25b   : > { %v602_v50 = vmul.f32 %v571_v12, %v1096_v13  ;;  %v603_v51 = vmul.f32 %v571_v12, %v1098_v14 }
 0x25d   : > { %618 = vst [vmem:[%s1248_s9 + $0x20] sm:$0xff] %v602_v50 }
 0x25e   : > { %619 = vst [vmem:[%s1248_s9 + $0x28] sm:$0xff] %v603_v51 }
 0x262   : > { %v586_v9 = vpop.permute.xlu1 %585 }
 0x263   : > { %v608_v10 = vmul.f32 %v586_v9, %v1074_v2  ;;  %v609_v18 = vmul.f32 %v586_v9, %v1078_v4 }
 0x265   : > { %624 = vst [vmem:[%s1248_s9 + $0x50] sm:$0xff] %v608_v10 }
 0x266   : > { %625 = vst [vmem:[%s1248_s9 + $0x58] sm:$0xff] %v609_v18 }
 0x26a   : > { %v596_v13 = vpop.permute.xlu1 %595 }
 0x26b   : > { %v612_v14 = vmul.f32 %v596_v13, %v1070_v0  ;;  %v613_v19 = vmul.f32 %v596_v13, %v1072_v1 }
 0x26d   : > { %628 = vst [vmem:[%s1248_s9 + $0x70] sm:$0xff] %v612_v14 }
 0x26e   : > { %629 = vst [vmem:[%s1248_s9 + $0x78] sm:$0xff] %v613_v19 }
 0x26f   : > { %898 = shalt.err (!%p895_p4)
}
 0x270   : > { %s942_s12 = smov 256   ;;  %s943_s28 = smov 16  }
 0x271   : > { %757 = dma.vmem_to_hbm [thread:$0]  (%p1024_p11), %s644_s23, 2048, %s646_s25, %s631_s22, %s942_s12, %s942_s12, %s943_s28  }
 0x272 PF: > { %s660_s9 = sand.u32 1, %s925_s18   ;;  %p1327_p7 = scmp.ge.s32.totalorder %s937_s21, 2 }
 0x273   : > { %s661_s14 = scalar_lea.sflag [#allocation4], %s660_s9 }
 0x274   : > { %p764_p5 = pnand %p1327_p7, %p1028_p12 }
 0x276   : > { %p765_p8 = pneg %p764_p5 }
 0x278   : > { %920 = dma.done.wait (%p765_p8), %s661_s14, 2048  }
 0x279   : > { %922 = vsyncadd (%p765_p8), %s661_s14, 4294965248  ;;  %p18_p10 = scmp.ge.s32.totalorder %s999_s24, 4   ;;  %s1328_s18 = smov %s929_s19 }
 0x27a   : > { %s1329_s19 = smov %s933_s20  ;;  %s1330_s20 = smov %s1011_s27 }
 0x27b   : > { %s1331_s21 = smov %s999_s24  ;;  %20 = sbr.rel (!%p18_p10) target bundleno = 5 (0x5), region = 85 }
 0x280   :  { %667 = vsyncpa [#allocation3], 1 }
 0x281   :  { %669 = vsyncpa [#allocation3 + $0x1], 1 }
 0x282   :  { %670 = vsyncpa [#allocation4], 1 }
 0x283   :  { %672 = vsyncpa [#allocation4 + $0x1], 1 }

</bundles_post_ra>
